<compile_context>
chip_gen: v5e
topology: v5e:2x2
jax: 0.10.0
libtpu: 0.0.40
codegen_flags: <defaults>
</compile_context>

<pallas_src>
import jax
import jax.numpy as jnp
from jax.experimental import pallas as pl
from jax.experimental.pallas import tpu as pltpu


def _round_up(n, m):
    return ((n + m - 1) // m) * m


def _ffn_kernel_single(x_ref, w1_ref, b1_ref, w2_ref, b2_ref, o_ref):
    # Fully fused path: the whole d_ff fits in one slab -> no accumulator.
    h = jnp.dot(x_ref[...], w1_ref[...], preferred_element_type=jnp.float32)
    h = jnp.maximum(h + b1_ref[...], 0.0)          # (TM, d_ff) + (1, d_ff)
    y = jnp.dot(h.astype(w2_ref.dtype), w2_ref[...],
                preferred_element_type=jnp.float32)
    o_ref[...] = (y + b2_ref[...]).astype(o_ref.dtype)


def _ffn_kernel_multi(x_ref, w1_ref, b1_ref, w2_ref, b2_ref, o_ref, acc_ref):
    k = pl.program_id(1)

    # Partial hidden for this d_ff slab: relu(x @ W1[:, kTF:(k+1)TF] + b1_slab)
    h = jnp.dot(x_ref[...], w1_ref[...], preferred_element_type=jnp.float32)
    h = jnp.maximum(h + b1_ref[...], 0.0)           # (TM, TF) + (1, TF)
    partial = jnp.dot(h.astype(w2_ref.dtype), w2_ref[...],
                      preferred_element_type=jnp.float32)

    # First slab initializes the accumulator (no separate zero-fill pass).
    @pl.when(k == 0)
    def _():
        acc_ref[...] = partial

    @pl.when(k > 0)
    def _():
        acc_ref[...] += partial

    @pl.when(k == pl.num_programs(1) - 1)
    def _():
        o_ref[...] = (acc_ref[...] + b2_ref[...]).astype(o_ref.dtype)


def positionwise_ffn(x, w1, b1, w2, b2, *, tm=256, tf=512):
    """x: [B, S, d_model]; w1: [d_model, d_ff]; b1: [d_ff];
       w2: [d_ff, d_model]; b2: [d_model]  ->  [B, S, d_model]"""
    B, S, d_model = x.shape
    d_ff = w1.shape[1]
    M = B * S
    x2d = x.reshape(M, d_model)

    # ---- row (M) tiling: pad to a TM multiple so every tile is full ----
    if M <= tm:
        TM = _round_up(M, 8)          # single row-tile, sublane-aligned
    else:
        TM = tm                       # multiple of 8 (and MXU-friendly)
    M_pad = _round_up(M, TM)
    if M_pad != M:
        x2d = jnp.pad(x2d, ((0, M_pad - M), (0, 0)))

    # ---- d_ff (reduction) tiling: zero-padding is exact for relu+matmul ----
    if d_ff <= tf:
        TF = d_ff
        F_pad = d_ff
    else:
        TF = tf                       # multiple of 128 (lane-aligned)
        F_pad = _round_up(d_ff, TF)
    if F_pad != d_ff:
        w1 = jnp.pad(w1, ((0, 0), (0, F_pad - d_ff)))
        b1 = jnp.pad(b1, ((0, F_pad - d_ff),))
        w2 = jnp.pad(w2, ((0, F_pad - d_ff), (0, 0)))

    b1_2d = b1.reshape(1, F_pad)
    b2_2d = b2.reshape(1, d_model)

    grid = (M_pad // TM, F_pad // TF)
    single_k = grid[1] == 1

    flops = 4 * M * d_model * d_ff     # two matmuls, 2 flops per MAC
    itemsize = jnp.dtype(x.dtype).itemsize
    bytes_accessed = (x2d.size + w1.size + b1_2d.size + w2.size + b2_2d.size
                      + M_pad * d_model) * itemsize

    kernel = _ffn_kernel_single if single_k else _ffn_kernel_multi
    scratch = [] if single_k else [pltpu.VMEM((TM, d_model), jnp.float32)]

    out2d = pl.pallas_call(
        kernel,
        out_shape=jax.ShapeDtypeStruct((M_pad, d_model), x.dtype),
        grid_spec=pltpu.PrefetchScalarGridSpec(
            num_scalar_prefetch=0,
            grid=grid,
            in_specs=[
                # x tile streams along rows, constant along the d_ff axis.
                pl.BlockSpec((TM, d_model), lambda i, k: (i, 0)),
                # Weights/biases: constant along rows, slabbed along d_ff.
                pl.BlockSpec((d_model, TF), lambda i, k: (0, k)),
                pl.BlockSpec((1, TF), lambda i, k: (0, k)),
                pl.BlockSpec((TF, d_model), lambda i, k: (k, 0)),
                pl.BlockSpec((1, d_model), lambda i, k: (0, 0)),
            ],
            out_specs=pl.BlockSpec((TM, d_model), lambda i, k: (i, 0)),
            scratch_shapes=scratch,
        ),
        compiler_params=pltpu.CompilerParams(
            dimension_semantics=("parallel", "arbitrary"),
            vmem_limit_bytes=64 * 1024 * 1024,
        ),
        cost_estimate=pl.CostEstimate(
            flops=flops, transcendentals=0, bytes_accessed=bytes_accessed),
    )(x2d, w1, b1_2d, w2, b2_2d)

    return out2d[:M].reshape(B, S, d_model)


def _init_params(key, d_model, d_ff, dtype=jnp.float32):
    # Deterministic init mimicking nn.Linear's uniform(-1/sqrt(fan_in), +...).
    k1, k2, k3, k4 = jax.random.split(key, 4)
    lim1 = 1.0 / (d_model ** 0.5)
    lim2 = 1.0 / (d_ff ** 0.5)
    # Stored pre-transposed relative to PyTorch's (out, in) weight layout.
    w1 = jax.random.uniform(k1, (d_model, d_ff), dtype, -lim1, lim1)
    b1 = jax.random.uniform(k2, (d_ff,), dtype, -lim1, lim1)
    w2 = jax.random.uniform(k3, (d_ff, d_model), dtype, -lim2, lim2)
    b2 = jax.random.uniform(k4, (d_model,), dtype, -lim2, lim2)
    return w1, b1, w2, b2


def _ref_ffn(x, w1, b1, w2, b2):
    return jnp.maximum(x @ w1 + b1, 0.0) @ w2 + b2


if __name__ == "__main__":
    key = jax.random.PRNGKey(0)
    kx, kp, kx2, kp2 = jax.random.split(key, 4)

    # --- test 1: small, even shapes (single row tile, single d_ff slab) ---
    B, S, d_model, d_ff = 2, 8, 32, 64
    x = jax.random.normal(kx, (B, S, d_model), dtype=jnp.float32)
    w1, b1, w2, b2 = _init_params(kp, d_model, d_ff)
    out = jax.block_until_ready(positionwise_ffn(x, w1, b1, w2, b2))
    ref = _ref_ffn(x, w1, b1, w2, b2)
    assert out.shape == (B, S, d_model)
    assert jnp.allclose(out, ref, atol=1e-5, rtol=1e-5)

    # --- test 2: ragged M and d_ff > TF (exercises row padding + reduction) ---
    B2, S2, d_model2, d_ff2 = 1, 13, 128, 640
    x2 = jax.random.normal(kx2, (B2, S2, d_model2), dtype=jnp.float32)
    w1b, b1b, w2b, b2b = _init_params(kp2, d_model2, d_ff2)
    out2 = jax.block_until_ready(positionwise_ffn(x2, w1b, b1b, w2b, b2b))
    ref2 = _ref_ffn(x2, w1b, b1b, w2b, b2b)
    assert out2.shape == (B2, S2, d_model2)
    assert jnp.allclose(out2, ref2, atol=1e-4, rtol=1e-4)

    print("KERNEL_OK")
</pallas_src>

<mosaic_0001>
module attributes {stable_mosaic.version = 11 : i64} {
  func.func @_ffn_kernel_single(%arg0: i32, %arg1: i32, %arg2: memref<16x32xf32, #tpu.memory_space<vmem>>, %arg3: memref<32x64xf32, #tpu.memory_space<vmem>>, %arg4: memref<1x64xf32, #tpu.memory_space<vmem>>, %arg5: memref<64x32xf32, #tpu.memory_space<vmem>>, %arg6: memref<1x32xf32, #tpu.memory_space<vmem>>, %arg7: memref<16x32xf32, #tpu.memory_space<vmem>>) attributes {dimension_semantics = [#tpu.dimension_semantics<parallel>, #tpu.dimension_semantics<arbitrary>], iteration_bounds = array<i64: 1, 1>, scalar_prefetch = 0 : i64, scratch_operands = 0 : i64, tpu.core_type = #tpu.core_type<tc>, window_params = [{transform_indices = @transform_0, window_bounds = array<i64: 16, 32>}, {transform_indices = @transform_1, window_bounds = array<i64: 32, 64>}, {transform_indices = @transform_2, window_bounds = array<i64: 1, 64>}, {transform_indices = @transform_3, window_bounds = array<i64: 64, 32>}, {pipeline_mode = #tpu.pipeline_mode<synchronous>, transform_indices = @transform_4, window_bounds = array<i64: 1, 32>}, {transform_indices = @transform_5, window_bounds = array<i64: 16, 32>}]} {
    %c0 = arith.constant 0 : index
    %c0_0 = arith.constant 0 : index
    %0 = vector.load %arg2[%c0, %c0_0] : memref<16x32xf32, #tpu.memory_space<vmem>>, vector<16x32xf32>
    %c0_1 = arith.constant 0 : index
    %c0_2 = arith.constant 0 : index
    %1 = vector.load %arg3[%c0_1, %c0_2] : memref<32x64xf32, #tpu.memory_space<vmem>>, vector<32x64xf32>
    %cst = arith.constant dense<0.000000e+00> : vector<16x64xf32>
    %2 = tpu.matmul %0, %1, %cst {dimension_numbers = #tpu.dot_dimension_numbers<[1], [0], [0], [1], [0, 0, 1, 1], [], []>} : vector<16x32xf32>, vector<32x64xf32>, vector<16x64xf32> -> vector<16x64xf32>
    %c0_3 = arith.constant 0 : index
    %c0_4 = arith.constant 0 : index
    %3 = vector.load %arg4[%c0_3, %c0_4] : memref<1x64xf32, #tpu.memory_space<vmem>>, vector<1x64xf32>
    %4 = vector.broadcast %3 : vector<1x64xf32> to vector<16x64xf32>
    %5 = arith.addf %2, %4 : vector<16x64xf32>
    %cst_5 = arith.constant 0.000000e+00 : f32
    %6 = vector.broadcast %cst_5 : f32 to vector<16x64xf32>
    %7 = arith.maximumf %5, %6 : vector<16x64xf32>
    %c0_6 = arith.constant 0 : index
    %c0_7 = arith.constant 0 : index
    %8 = vector.load %arg5[%c0_6, %c0_7] : memref<64x32xf32, #tpu.memory_space<vmem>>, vector<64x32xf32>
    %cst_8 = arith.constant dense<0.000000e+00> : vector<16x32xf32>
    %9 = tpu.matmul %7, %8, %cst_8 {dimension_numbers = #tpu.dot_dimension_numbers<[1], [0], [0], [1], [0, 0, 1, 1], [], []>} : vector<16x64xf32>, vector<64x32xf32>, vector<16x32xf32> -> vector<16x32xf32>
    %c0_9 = arith.constant 0 : index
    %c0_10 = arith.constant 0 : index
    %10 = vector.load %arg6[%c0_9, %c0_10] : memref<1x32xf32, #tpu.memory_space<vmem>>, vector<1x32xf32>
    %11 = vector.broadcast %10 : vector<1x32xf32> to vector<16x32xf32>
    %12 = arith.addf %9, %11 : vector<16x32xf32>
    %c0_11 = arith.constant 0 : index
    %c0_12 = arith.constant 0 : index
    %13 = vector.load %arg7[%c0_11, %c0_12] : memref<16x32xf32, #tpu.memory_space<vmem>>, vector<16x32xf32>
    tpu.vector_store %arg7[%c0_11, %c0_12], %12 {strides = array<i32>} : memref<16x32xf32, #tpu.memory_space<vmem>>, vector<16x32xf32>,
    return
  }
  func.func @transform_0(%arg0: i32, %arg1: i32) -> (i32, i32) {
    %c0_i32 = arith.constant 0 : i32
    %c0_i32_0 = arith.constant 0 : i32
    return %arg0, %c0_i32 : i32, i32
  }
  func.func @transform_1(%arg0: i32, %arg1: i32) -> (i32, i32) {
    %c0_i32 = arith.constant 0 : i32
    %c0_i32_0 = arith.constant 0 : i32
    return %c0_i32, %arg1 : i32, i32
  }
  func.func @transform_2(%arg0: i32, %arg1: i32) -> (i32, i32) {
    %c0_i32 = arith.constant 0 : i32
    %c0_i32_0 = arith.constant 0 : i32
    return %c0_i32, %arg1 : i32, i32
  }
  func.func @transform_3(%arg0: i32, %arg1: i32) -> (i32, i32) {
    %c0_i32 = arith.constant 0 : i32
    %c0_i32_0 = arith.constant 0 : i32
    return %arg1, %c0_i32 : i32, i32
  }
  func.func @transform_4(%arg0: i32, %arg1: i32) -> (i32, i32) {
    %c0_i32 = arith.constant 0 : i32
    %c0_i32_0 = arith.constant 0 : i32
    %c0_i32_1 = arith.constant 0 : i32
    return %c0_i32, %c0_i32_0 : i32, i32
  }
  func.func @transform_5(%arg0: i32, %arg1: i32) -> (i32, i32) {
    %c0_i32 = arith.constant 0 : i32
    %c0_i32_0 = arith.constant 0 : i32
    return %arg0, %c0_i32 : i32, i32
  }
}

</mosaic_0001>

<bundles_post_ra>
// kernel: tpu_custom_call.1
= control target key start
LH: loop header
LB: loop body
LE: loop exit
PB: predicated region body
PF: predicated region fallthrough
CT: control target
= control target key end

     0   :  { %s260_s0 = inlined_call_operand.vmem [shape: f32[16,32], index: 0, kind: input, shape index: {}]   ;;  %s261_s1 = inlined_call_operand.vmem [shape: f32[32,64], index: 1, kind: input, shape index: {}]   ;;  %s262_s2 = inlined_call_operand.vmem [shape: f32[1,64], index: 2, kind: input, shape index: {}]   ;;  %s263_s3 = inlined_call_operand.vmem [shape: f32[64,32], index: 3, kind: input, shape index: {}]   ;;  %s264_s4 = inlined_call_operand.vmem [shape: f32[1,32], index: 4, kind: input, shape index: {}]   ;;  %s265_s5 = inlined_call_operand.hbm [shape: f32[16,32], index: 5, kind: output, shape index: {}]  }
   0x1   :  { %v26_v0 = vld [vmem:[%s261_s1 + $0x18] sm:$0xff]  ;;  %v25_v1 = vld [vmem:[%s261_s1 + $0x10] sm:$0xff]  ;;  %v24_v2 = vld [vmem:[%s261_s1 + $0x8] sm:$0xff] }
   0x2   :  { %129 = vmatpush.msra.mxu3 %v26_v0  ;;  %50 = vmatpush.msra.mxu0 %v26_v0  ;;  %v70_v3 = vld [vmem:[%s263_s3 + $0x38] sm:$0xff]  ;;  %v69_v4 = vld [vmem:[%s263_s3 + $0x30] sm:$0xff]  ;;  %v23_v5 = vld [vmem:[%s261_s1] sm:$0xff] }
   0x3   :  { %133 = vmatpush.msra.mxu2 %v70_v3  ;;  %90 = vmatpush.msra.mxu1 %v70_v3 }
   0x4   :  { %130 = vmatpush.msra.mxu3 %v25_v1  ;;  %51 = vmatpush.msra.mxu0 %v25_v1 }
   0x5   :  { %10 = vsyncpa [#allocation3], 0  ;;  %v22_v6 = vld [vmem:[%s260_s0 + $0x8] sm:$0xff]  ;;  %vm31_vm0 = vcmask 261120   ;;  %v21_v7 = vld [vmem:[%s260_s0] sm:$0xff]  ;;  %134 = vmatpush.msra.mxu2 %v69_v4  ;;  %91 = vmatpush.msra.mxu1 %v69_v4  ;;  %vm75_vm1 = vcmask 523264  }
   0x6   :  { %131 = vmatpush.msra.mxu3 %v24_v2  ;;  %52 = vmatpush.msra.mxu0 %v24_v2  ;;  %v68_v8 = vld [vmem:[%s263_s3 + $0x28] sm:$0xff]  ;;  %v67_v9 = vld [vmem:[%s263_s3 + $0x20] sm:$0xff]  ;;  %v66_v10 = vld [vmem:[%s263_s3 + $0x18] sm:$0xff]  ;;  %s113_s25 = sshll.u32 %s265_s5, 4  ;;  %s173_s26 = smov 128   ;;  %s114_s25 = int_to_ptr.hbm [resolvable:$true] %s113_s25 }
   0x7   :  { %135 = vmatpush.msra.mxu2 %v68_v8  ;;  %92 = vmatpush.msra.mxu1 %v68_v8  ;;  %v65_v11 = vld [vmem:[%s263_s3 + $0x10] sm:$0xff]  ;;  %v64_v12 = vld [vmem:[%s263_s3 + $0x8] sm:$0xff]  ;;  %v63_v13 = vld [vmem:[%s263_s3] sm:$0xff]  ;;  %s172_s3 = smov [#allocation2]   ;;  %s174_s27 = smov 8  }
   0x8   :  { %132 = vmatpush.msra.mxu3 %v23_v5  ;;  %53 = vmatpush.msra.mxu0 %v23_v5  ;;  %v144_v14 = vld [vmem:[%s262_s2] ss:$0 sm:$0xff]  ;;  %s111_s23 = sshll.u32 %s172_s3, 4  ;;  %s112_s23 = int_to_ptr.vmem [resolvable:$true] %s111_s23 }
   0x9   :  { %126 = vmatmul.msk.f32.vlgmr.msra.gmra.mxu3 %vm31_vm0, %v22_v6  ;;  %125 = vmatmul.msk.f32.vlgmr.msra.gmra.mxu0 %vm31_vm0, %v21_v7  ;;  %v145_v21 = vld [vmem:[%s264_s4] ss:$0 sm:$0xff] }
   0xa   :  { %136 = vmatpush.msra.mxu2 %v67_v9  ;;  %93 = vmatpush.msra.mxu1 %v67_v9 }
   0xc   :  { %137 = vmatpush.msra.mxu2 %v66_v10  ;;  %94 = vmatpush.msra.mxu1 %v66_v10 }
   0xe   :  { %138 = vmatpush.msra.mxu2 %v65_v11  ;;  %95 = vmatpush.msra.mxu1 %v65_v11 }
  0x10   :  { %139 = vmatpush.msra.mxu2 %v64_v12  ;;  %96 = vmatpush.msra.mxu1 %v64_v12 }
  0x12   :  { %140 = vmatpush.msra.mxu2 %v63_v13  ;;  %97 = vmatpush.msra.mxu1 %v63_v13 }
  0x86   :  { %v55_v15 = vpop.f32.mrf.mxu0 }
  0x87   :  { %v56_v16 = vadd.f32 %v144_v14, %v55_v15 }
  0x89   :  { %v61_v17 = vmax.f32 %v56_v16, 0.0 }
  0x8b   :  { %127 = vmatmul.msk.f32.vlgmr.msra.gmra.mxu1 %vm75_vm1, %v61_v17 }
  0x8c   :  { %v58_v18 = vpop.f32.mrf.mxu3 }
  0x8d   :  { %v59_v19 = vadd.f32 %v144_v14, %v58_v18 }
  0x8f   :  { %v62_v20 = vmax.f32 %v59_v19, 0.0 }
  0x91   :  { %128 = vmatmul.msk.f32.vlgmr.msra.gmra.mxu2 %vm75_vm1, %v62_v20 }
 0x108   :  { %v99_v22 = vpop.f32.mrf.mxu1 }
 0x109   :  { %v100_v23 = vadd.f32 %v145_v21, %v99_v22 }
 0x10b   :  { %105 = vst.msk [vmem:[#allocation2] sm:$0xff] %vm31_vm0, %v100_v23 }
 0x114   :  { %v102_v24 = vpop.f32.mrf.mxu2 }
 0x115   :  { %v103_v25 = vadd.f32 %v145_v21, %v102_v24 }
 0x117   :  { %106 = vst.msk [vmem:[#allocation2 + $0x8] sm:$0xff] %vm31_vm0, %v103_v25 }
 0x118   :  { %119 = dma.vmem_to_hbm [thread:$0]  %s112_s23, 256, %s114_s25, [#allocation3], %s173_s26, %s173_s26, %s174_s27  }
 0x119   :  { %170 = dma.done.wait [#allocation3], 256  }
 0x11a   :  { %171 = vsyncadd [#allocation3], 4294967040 }
 0x11b   :  { %124 = vsyncpa [#allocation3], 1 }

</bundles_post_ra>
